<compile_context>
chip_gen: v7x
topology: tpu7x:2x2x1
jax: 0.10.0
libtpu: 0.0.40
codegen_flags: <defaults>
</compile_context>

<pallas_src>
import functools
import math

import jax
import jax.numpy as jnp
from jax.experimental import pallas as pl
from jax.experimental.pallas import tpu as pltpu

EPS = 1e-5  # nn.LayerNorm default


def _merge_ln_reduce_kernel(xe_ref, xo_ref, we_ref, wo_ref, b_ref, o_ref, *, c4, eps):
    """One grid step: ti H-row-pairs -> ti*Wh merged tokens.

    xe_ref / xo_ref: (ti, Wh, 2C)  even-/odd-image-row slabs of the 2x2 neighborhoods
    we_ref / wo_ref: (2C, N)       gamma-folded weight halves (N = 2*C_out)
    b_ref:           (1, N)        beta @ W
    o_ref:           (ti*Wh, N)    lane/sublane-dense output slab
    """
    ti, wh, c2 = xe_ref.shape
    m = ti * wh

    # Whole-slab loads, collapsed to one big-M (m, 2C) matrix per parity so the MXU
    # sees a single large matmul per slab instead of Wh tiny (ti x 2C) ones.
    xe = xe_ref[...].reshape(m, c2).astype(jnp.float32)   # rows carry [x0 | x2]
    xo = xo_ref[...].reshape(m, c2).astype(jnp.float32)   # rows carry [x1 | x3]

    # One-pass LayerNorm statistics over the full 4C group (both slabs together).
    inv_c4 = 1.0 / c4
    s1 = jnp.sum(xe, axis=-1, keepdims=True) + jnp.sum(xo, axis=-1, keepdims=True)
    s2 = (jnp.sum(xe * xe, axis=-1, keepdims=True)
          + jnp.sum(xo * xo, axis=-1, keepdims=True))
    mean = s1 * inv_c4
    var = jnp.maximum(s2 * inv_c4 - mean * mean, 0.0)     # biased variance, as nn.LayerNorm
    rstd = jax.lax.rsqrt(var + eps)

    # Normalize (gamma/beta already folded into we/wo/bias) and reduce on the MXU:
    #   out = xn_even @ W_even + xn_odd @ W_odd + beta @ W
    ne = ((xe - mean) * rstd).astype(we_ref.dtype)
    no = ((xo - mean) * rstd).astype(wo_ref.dtype)
    acc = jnp.dot(ne, we_ref[...], preferred_element_type=jnp.float32)
    acc = acc + jnp.dot(no, wo_ref[...], preferred_element_type=jnp.float32)
    acc = acc + b_ref[...].astype(jnp.float32)            # (1, N) broadcast, once per step
    o_ref[...] = acc.astype(o_ref.dtype)                  # single unmasked full-block store


def patch_merging_forward(x, H, W, weight, gamma, beta, *,
                          row_target=1024, mxu_dtype=jnp.bfloat16, out_dtype=None):
    """x: (B, L, C) with L == H*W; weight: (4C, 2C_out) (in x out); returns (B, L//4, 2C_out)."""
    B, L, C = x.shape
    assert L == H * W, "input feature has wrong size"
    assert H % 2 == 0 and W % 2 == 0, f"x size ({H}*{W}) are not even."
    Hh, Wh = H // 2, W // 2
    C2, C4 = 2 * C, 4 * C
    N = weight.shape[1]
    assert weight.shape == (C4, N)
    out_dtype = x.dtype if out_dtype is None else out_dtype
    # TODO(synk): in a bf16 end-to-end model pass bf16 x / out_dtype=jnp.bfloat16 to halve
    # HBM traffic; the demo keeps f32 I/O for a tight reference comparison.

    # ---- one-time parameter prep: fold the LN affine into the reduction weight ----
    #   (xn * gamma + beta) @ W == xn @ (gamma[:, None] * W) + beta @ W
    wf = jnp.asarray(weight, jnp.float32)
    wg = jnp.asarray(gamma, jnp.float32).reshape(C4, 1) * wf
    bias = jnp.asarray(beta, jnp.float32).reshape(1, C4) @ wf             # (1, N)
    # K-split matching the slab channel order: even image rows carry [x0|x2], odd [x1|x3].
    w_even = jnp.concatenate([wg[0:C], wg[2 * C:3 * C]], axis=0).astype(mxu_dtype)
    w_odd = jnp.concatenate([wg[C:2 * C], wg[3 * C:4 * C]], axis=0).astype(mxu_dtype)

    # ---- free (metadata-only) reshape exposing the H-parity axis ----
    P = B * Hh
    x4 = x.reshape(P, 2, Wh, C2)

    # ---- tiling: ti H-row-pairs per grid step (= ti*Wh merged tokens), ragged tail ok ----
    g = 8 // math.gcd(8, Wh)                 # keeps the (ti*Wh, N) output block sublane-aligned

    def _align(t):
        return min(P, max(g, (t // g) * g))

    ti = max(1, min(row_target // max(Wh, 1), P))          # target ~1024 merged rows / step
    min_grid = min(P, 4)                                    # >=2 steps/TC (v7x), >=4 steps (v5e/v6e)
    ti = min(ti, max(1, pl.cdiv(P, min_grid)))
    ti = _align(ti)

    # ---- explicit VMEM budget from PADDED tile bytes (sublane 8 / lane 128) ----
    def _pad(v, m):
        return -(-v // m) * m

    in_item = jnp.dtype(x.dtype).itemsize
    out_item = jnp.dtype(out_dtype).itemsize
    w_item = jnp.dtype(mxu_dtype).itemsize

    def _vmem_need(t):
        in_tile = t * _pad(Wh, 8) * _pad(C2, 128) * in_item               # one parity slab
        out_tile = _pad(t * Wh, 8) * _pad(N, 128) * out_item
        w_bytes = 2 * _pad(C2, 8) * _pad(N, 128) * w_item + 8 * _pad(N, 128) * 4
        return 2 * (2 * in_tile + out_tile + w_bytes)                     # 2-deep pipelining

    VMEM_CAP = 48 * 2 ** 20                  # leave headroom under v7x's 64 MiB/core
    while ti > g and _vmem_need(ti) > VMEM_CAP:
        ti = _align(ti // 2)
    grid = (pl.cdiv(P, ti),)
    vmem_limit = int(min(VMEM_CAP, max(32 * 2 ** 20, 2 * _vmem_need(ti))))

    kernel = functools.partial(_merge_ln_reduce_kernel, c4=C4, eps=EPS)

    out = pl.pallas_call(
        kernel,
        # 2D output => each grid step writes one lane/sublane-dense (ti*Wh, N) slab.
        out_shape=jax.ShapeDtypeStruct((P * Wh, N), out_dtype),
        grid_spec=pltpu.PrefetchScalarGridSpec(
            num_scalar_prefetch=0,
            grid=grid,
            in_specs=[
                # Same array passed twice; the squeezed parity axis picks even/odd image
                # rows.  Trailing (Wh, 2C) block dims equal the full array dims, so the
                # (8,128) tiling rule is always satisfied on the inputs.
                pl.BlockSpec((ti, None, Wh, C2), lambda i: (i, 0, 0, 0)),  # even H rows
                pl.BlockSpec((ti, None, Wh, C2), lambda i: (i, 1, 0, 0)),  # odd  H rows
                pl.BlockSpec((C2, N), lambda i: (0, 0)),
                pl.BlockSpec((C2, N), lambda i: (0, 0)),
                pl.BlockSpec((1, N), lambda i: (0, 0)),
            ],
            out_specs=pl.BlockSpec((ti * Wh, N), lambda i: (i, 0)),
        ),
        compiler_params=pltpu.CompilerParams(
            dimension_semantics=("parallel",),
            vmem_limit_bytes=vmem_limit,
        ),
    )(x4, x4, w_even, w_odd, bias)

    return out.reshape(B, Hh * Wh, N)


def reference_forward(x, H, W, weight, gamma, beta):
    """Pure-JAX f32 reference mirroring the PyTorch module."""
    B, L, C = x.shape
    xg = x.reshape(B, H, W, C)
    x0 = xg[:, 0::2, 0::2, :]
    x1 = xg[:, 1::2, 0::2, :]
    x2 = xg[:, 0::2, 1::2, :]
    x3 = xg[:, 1::2, 1::2, :]
    m = jnp.concatenate([x0, x1, x2, x3], axis=-1).reshape(B, -1, 4 * C)
    mean = jnp.mean(m, axis=-1, keepdims=True)
    var = jnp.mean((m - mean) ** 2, axis=-1, keepdims=True)
    mn = (m - mean) / jnp.sqrt(var + EPS) * gamma + beta
    return jnp.einsum("blk,kn->bln", mn, weight)


if __name__ == "__main__":
    # Small shapes consistent with the module: dim=64, input_resolution=(16, 16), B=2.
    # (dim=64 keeps both the 2C input slabs and the 2C output lane-dense: 128 lanes.)
    B, H, W, dim = 2, 16, 16, 64
    L = H * W

    key = jax.random.PRNGKey(0)
    kx, kw, kg, kb = jax.random.split(key, 4)

    x = jax.random.normal(kx, (B, L, dim), dtype=jnp.float32)
    # nn.Linear(4*dim, 2*dim, bias=False): stored as (in=4*dim, out=2*dim)
    weight = jax.random.normal(kw, (4 * dim, 2 * dim), dtype=jnp.float32) * 0.02
    # nn.LayerNorm(4*dim): gamma ~ 1, beta ~ 0 (deterministic perturbations)
    gamma = 1.0 + 0.01 * jax.random.normal(kg, (4 * dim,), dtype=jnp.float32)
    beta = 0.01 * jax.random.normal(kb, (4 * dim,), dtype=jnp.float32)

    out = patch_merging_forward(x, H, W, weight, gamma, beta)
    out = jax.block_until_ready(out)

    ref = reference_forward(x, H, W, weight, gamma, beta)
    assert out.shape == (B, L // 4, 2 * dim), out.shape
    # bf16 MXU operands with f32 accumulation -> small deviations vs the f32 reference.
    max_err = float(jnp.max(jnp.abs(out - ref)))
    assert jnp.allclose(out, ref, atol=2e-2, rtol=2e-2), f"mismatch vs reference (max abs err {max_err})"

    print("KERNEL_OK")
</pallas_src>

<mosaic_0001>
module attributes {stable_mosaic.version = 11 : i64} {
  func.func @_merge_ln_reduce_kernel(%arg0: i32, %arg1: memref<4x1x8x128xf32, #tpu.memory_space<vmem>>, %arg2: memref<4x1x8x128xf32, #tpu.memory_space<vmem>>, %arg3: memref<128x128xbf16, #tpu.memory_space<vmem>>, %arg4: memref<128x128xbf16, #tpu.memory_space<vmem>>, %arg5: memref<1x128xf32, #tpu.memory_space<vmem>>, %arg6: memref<32x128xf32, #tpu.memory_space<vmem>>) attributes {dimension_semantics = [#tpu.dimension_semantics<parallel>], iteration_bounds = array<i64: 4>, scalar_prefetch = 0 : i64, scratch_operands = 0 : i64, tpu.core_type = #tpu.core_type<tc>, window_params = [{transform_indices = @transform_0, window_bounds = array<i64: 4, 1, 8, 128>}, {transform_indices = @transform_1, window_bounds = array<i64: 4, 1, 8, 128>}, {pipeline_mode = #tpu.pipeline_mode<synchronous>, transform_indices = @transform_2, window_bounds = array<i64: 128, 128>}, {pipeline_mode = #tpu.pipeline_mode<synchronous>, transform_indices = @transform_3, window_bounds = array<i64: 128, 128>}, {pipeline_mode = #tpu.pipeline_mode<synchronous>, transform_indices = @transform_4, window_bounds = array<i64: 1, 128>}, {transform_indices = @transform_5, window_bounds = array<i64: 32, 128>}]} {
    %c0 = arith.constant 0 : index
    %c0_0 = arith.constant 0 : index
    %c0_1 = arith.constant 0 : index
    %c0_2 = arith.constant 0 : index
    %0 = vector.load %arg1[%c0, %c0_0, %c0_1, %c0_2] : memref<4x1x8x128xf32, #tpu.memory_space<vmem>>, vector<4x1x8x128xf32>
    %1 = vector.shape_cast %0 : vector<4x1x8x128xf32> to vector<4x8x128xf32>
    %2 = vector.shape_cast %1 : vector<4x8x128xf32> to vector<32x128xf32>
    %c0_3 = arith.constant 0 : index
    %c0_4 = arith.constant 0 : index
    %c0_5 = arith.constant 0 : index
    %c0_6 = arith.constant 0 : index
    %3 = vector.load %arg2[%c0_3, %c0_4, %c0_5, %c0_6] : memref<4x1x8x128xf32, #tpu.memory_space<vmem>>, vector<4x1x8x128xf32>
    %4 = vector.shape_cast %3 : vector<4x1x8x128xf32> to vector<4x8x128xf32>
    %5 = vector.shape_cast %4 : vector<4x8x128xf32> to vector<32x128xf32>
    %cst = arith.constant dense<0.000000e+00> : vector<32xf32>
    %6 = vector.multi_reduction <add>, %2, %cst [1] : vector<32x128xf32> to vector<32xf32>
    %7 = vector.shape_cast %6 : vector<32xf32> to vector<32x1xf32>
    %cst_7 = arith.constant dense<0.000000e+00> : vector<32xf32>
    %8 = vector.multi_reduction <add>, %5, %cst_7 [1] : vector<32x128xf32> to vector<32xf32>
    %9 = vector.shape_cast %8 : vector<32xf32> to vector<32x1xf32>
    %10 = arith.addf %7, %9 : vector<32x1xf32>
    %11 = arith.mulf %2, %2 : vector<32x128xf32>
    %cst_8 = arith.constant dense<0.000000e+00> : vector<32xf32>
    %12 = vector.multi_reduction <add>, %11, %cst_8 [1] : vector<32x128xf32> to vector<32xf32>
    %13 = vector.shape_cast %12 : vector<32xf32> to vector<32x1xf32>
    %14 = arith.mulf %5, %5 : vector<32x128xf32>
    %cst_9 = arith.constant dense<0.000000e+00> : vector<32xf32>
    %15 = vector.multi_reduction <add>, %14, %cst_9 [1] : vector<32x128xf32> to vector<32xf32>
    %16 = vector.shape_cast %15 : vector<32xf32> to vector<32x1xf32>
    %17 = arith.addf %13, %16 : vector<32x1xf32>
    %cst_10 = arith.constant 3.906250e-03 : f32
    %18 = vector.broadcast %cst_10 : f32 to vector<32x1xf32>
    %19 = arith.mulf %10, %18 : vector<32x1xf32>
    %cst_11 = arith.constant 3.906250e-03 : f32
    %20 = vector.broadcast %cst_11 : f32 to vector<32x1xf32>
    %21 = arith.mulf %17, %20 : vector<32x1xf32>
    %22 = arith.mulf %19, %19 : vector<32x1xf32>
    %23 = arith.subf %21, %22 : vector<32x1xf32>
    %cst_12 = arith.constant 0.000000e+00 : f32
    %24 = vector.broadcast %cst_12 : f32 to vector<32x1xf32>
    %25 = arith.maximumf %23, %24 : vector<32x1xf32>
    %cst_13 = arith.constant 9.99999974E-6 : f32
    %26 = vector.broadcast %cst_13 : f32 to vector<32x1xf32>
    %27 = arith.addf %25, %26 : vector<32x1xf32>
    %28 = math.rsqrt %27 : vector<32x1xf32>
    %29 = vector.broadcast %19 : vector<32x1xf32> to vector<32x128xf32>
    %30 = arith.subf %2, %29 : vector<32x128xf32>
    %31 = vector.broadcast %28 : vector<32x1xf32> to vector<32x128xf32>
    %32 = arith.mulf %30, %31 : vector<32x128xf32>
    %33 = arith.truncf %32 : vector<32x128xf32> to vector<32x128xbf16>
    %34 = vector.broadcast %19 : vector<32x1xf32> to vector<32x128xf32>
    %35 = arith.subf %5, %34 : vector<32x128xf32>
    %36 = vector.broadcast %28 : vector<32x1xf32> to vector<32x128xf32>
    %37 = arith.mulf %35, %36 : vector<32x128xf32>
    %38 = arith.truncf %37 : vector<32x128xf32> to vector<32x128xbf16>
    %c0_14 = arith.constant 0 : index
    %c0_15 = arith.constant 0 : index
    %39 = vector.load %arg3[%c0_14, %c0_15] : memref<128x128xbf16, #tpu.memory_space<vmem>>, vector<128x128xbf16>
    %cst_16 = arith.constant dense<0.000000e+00> : vector<32x128xf32>
    %40 = tpu.matmul %33, %39, %cst_16 {dimension_numbers = #tpu.dot_dimension_numbers<[1], [0], [0], [1], [0, 0, 1, 1], [], []>} : vector<32x128xbf16>, vector<128x128xbf16>, vector<32x128xf32> -> vector<32x128xf32>
    %c0_17 = arith.constant 0 : index
    %c0_18 = arith.constant 0 : index
    %41 = vector.load %arg4[%c0_17, %c0_18] : memref<128x128xbf16, #tpu.memory_space<vmem>>, vector<128x128xbf16>
    %cst_19 = arith.constant dense<0.000000e+00> : vector<32x128xf32>
    %42 = tpu.matmul %38, %41, %cst_19 {dimension_numbers = #tpu.dot_dimension_numbers<[1], [0], [0], [1], [0, 0, 1, 1], [], []>} : vector<32x128xbf16>, vector<128x128xbf16>, vector<32x128xf32> -> vector<32x128xf32>
    %43 = arith.addf %40, %42 : vector<32x128xf32>
    %c0_20 = arith.constant 0 : index
    %c0_21 = arith.constant 0 : index
    %44 = vector.load %arg5[%c0_20, %c0_21] : memref<1x128xf32, #tpu.memory_space<vmem>>, vector<1x128xf32>
    %45 = vector.broadcast %44 : vector<1x128xf32> to vector<32x128xf32>
    %46 = arith.addf %43, %45 : vector<32x128xf32>
    %c0_22 = arith.constant 0 : index
    %c0_23 = arith.constant 0 : index
    %47 = vector.load %arg6[%c0_22, %c0_23] : memref<32x128xf32, #tpu.memory_space<vmem>>, vector<32x128xf32>
    tpu.vector_store %arg6[%c0_22, %c0_23], %46 {strides = array<i32>} : memref<32x128xf32, #tpu.memory_space<vmem>>, vector<32x128xf32>,
    return
  }
  func.func @transform_0(%arg0: i32) -> (i32, i32, i32, i32) {
    %c0_i32 = arith.constant 0 : i32
    %c0_i32_0 = arith.constant 0 : i32
    %c0_i32_1 = arith.constant 0 : i32
    %c0_i32_2 = arith.constant 0 : i32
    return %arg0, %c0_i32, %c0_i32_0, %c0_i32_1 : i32, i32, i32, i32
  }
  func.func @transform_1(%arg0: i32) -> (i32, i32, i32, i32) {
    %c1_i32 = arith.constant 1 : i32
    %c0_i32 = arith.constant 0 : i32
    %c0_i32_0 = arith.constant 0 : i32
    %c0_i32_1 = arith.constant 0 : i32
    return %arg0, %c1_i32, %c0_i32, %c0_i32_0 : i32, i32, i32, i32
  }
  func.func @transform_2(%arg0: i32) -> (i32, i32) {
    %c0_i32 = arith.constant 0 : i32
    %c0_i32_0 = arith.constant 0 : i32
    %c0_i32_1 = arith.constant 0 : i32
    return %c0_i32, %c0_i32_0 : i32, i32
  }
  func.func @transform_3(%arg0: i32) -> (i32, i32) {
    %c0_i32 = arith.constant 0 : i32
    %c0_i32_0 = arith.constant 0 : i32
    %c0_i32_1 = arith.constant 0 : i32
    return %c0_i32, %c0_i32_0 : i32, i32
  }
  func.func @transform_4(%arg0: i32) -> (i32, i32) {
    %c0_i32 = arith.constant 0 : i32
    %c0_i32_0 = arith.constant 0 : i32
    %c0_i32_1 = arith.constant 0 : i32
    return %c0_i32, %c0_i32_0 : i32, i32
  }
  func.func @transform_5(%arg0: i32) -> (i32, i32) {
    %c0_i32 = arith.constant 0 : i32
    %c0_i32_0 = arith.constant 0 : i32
    return %arg0, %c0_i32 : i32, i32
  }
}

</mosaic_0001>

<bundles_post_ra>
// kernel: tpu_custom_call.1
= control target key start
LH: loop header
LB: loop body
LE: loop exit
PB: predicated region body
PF: predicated region fallthrough
CT: control target
= control target key end

     0   :  { %s1581_s0 = inlined_call_operand.hbm [shape: f32[16,2,8,128], index: 0, kind: input, shape index: {}]   ;;  %s1582_s1 = inlined_call_operand.hbm [shape: f32[16,2,8,128], index: 1, kind: input, shape index: {}]   ;;  %s1583_s2 = inlined_call_operand.hbm [shape: bf16[128,128], index: 2, kind: input, shape index: {}]   ;;  %s1584_s3 = inlined_call_operand.hbm [shape: bf16[128,128], index: 3, kind: input, shape index: {}]   ;;  %s1585_s4 = inlined_call_operand.vmem [shape: f32[1,128], index: 4, kind: input, shape index: {}]   ;;  %s1586_s5 = inlined_call_operand.hbm [shape: f32[128,128], index: 5, kind: output, shape index: {}]  }
   0x1   :  { %1592 = sst [smem:[#allocation17_spill]] %s1581_s0 }
   0x2   :  { %1593 = sst [smem:[#allocation18_spill]] %s1583_s2 }
   0x3   :  { %1594 = sst [smem:[#allocation19_spill]] %s1584_s3 }
   0x4   :  { %10 = vsyncpa [#allocation3], 0 }
   0x5   :  { %12 = vsyncpa [#allocation3 + $0x1], 0 }
   0x6   :  { %13 = vsyncpa [#allocation6], 0 }
   0x7   :  { %15 = vsyncpa [#allocation6 + $0x1], 0 }
   0x8   :  { %16 = vsyncpa [#allocation9], 0 }
   0x9   :  { %17 = vsyncpa [#allocation4], 0 }
   0xa   :  { %19 = vsyncpa [#allocation4 + $0x1], 0  ;;  %s1245_s18 = smov 0   ;;  %s1247_s19 = smov 0  }
   0xb   :  { %s1249_s20 = smov 0   ;;  %s1251_s21 = smov 0  }
   0xc LB: > { %s1266_s22 = sadd.s32 4294967295, %s1201_s21   ;;  %s795_s23 = sadd.s32 4294967294, %s1201_s21   ;;  %s1201_s21 = sphi %s1251_s21, %s1621_s21   ;;  %s1197_s20 = sphi %s1249_s20, %s1620_s20   ;;  %s1193_s19 = sphi %s1247_s19, %s1619_s19   ;;  %s1189_s18 = sphi %s1245_s18, %s1618_s18  }
   0xd   : > { %s1270_s24 = sadd.s32 1, %s1201_s21   ;;  %s32_s25 = sadd.s32 1, %s1197_s20 }
   0xe   : > { %s29_s26 = ssub.s32 %s1201_s21, %s1270_s24  ;;  %p39_p0 = scmp.ne.s32.totalorder %s1197_s20, %s1193_s19 }
   0xf   : > { %p30_p1 = scmp.eq.s32.totalorder %s29_s26, 0  ;;  %p40_p2 = scmp.eq.s32.totalorder %s1201_s21, 0 }
  0x10   : > { %p45_p3 = scmp.ne.s32.totalorder %s1193_s19, %s1189_s18  ;;  %p1587_p4 = scmp.eq.s32.totalorder %s1266_s22, 0 }
  0x11   : > { %s1282_s27 = scalar_select %p30_p1, %s1197_s20, %s32_s25  }
  0x12   : > { %p1284_p5 = por %p40_p2, %p39_p0  ;;  %p1290_p6 = por %p1587_p4, %p45_p3 }
  0x13   : > { %1595 = sst [smem:[#allocation16_spill]] %s1282_s27  ;;  %p158_p7 = scmp.eq.s32.totalorder %s1266_s22, 3 }
  0x14   : > { %s1596_s28 = scalar_select %p1284_p5, 1, 0 }
  0x15   : > { %s1597_s29 = scalar_select %p1290_p6, 1, 0 }
  0x16   : > { %p164_p8 = scmp.eq.s32.totalorder %s795_s23, 3  ;;  %p796_p9 = scmp.ge.s32.totalorder %s1201_s21, 1 }
  0x17   : > { %p171_p10 = scmp.lt.s32.totalorder %s1201_s21, 5  ;;  %p1297_p11 = por %p158_p7, %p39_p0 }
  0x18   : > { %p1301_p12 = por %p164_p8, %p45_p3  ;;  %s1203_s8 = smov [#allocation7]  }
  0x19   : > { %s1598_s30 = scalar_select %p1297_p11, 1, 0 }
  0x1a   : > { %s1599_s6 = scalar_select %p1301_p12, 1, 0 }
  0x1b   : > { %p1305_p13 = pnand %p796_p9, %p171_p10  ;;  %s183_s9 = sshll.u32 %s1203_s8, 4  ;;  %s184_s9 = int_to_ptr.vmem [resolvable:$true] %s183_s9 }
  0x1c   : > { %s1204_s11 = smov [#allocation8]   ;;  %s1602_s2 = sld [smem:[#allocation18_spill]] }
  0x1d   : > { %s1600_s7 = scalar_select %p1305_p13, 1, 0 }
  0x1e   : > { %p917_p1 = pneg %p1305_p13  ;;  %s196_s12 = sshll.u32 %s1204_s11, 4  ;;  %s197_s12 = int_to_ptr.vmem [resolvable:$true] %s196_s12 }
  0x20   : > { %p1313_p2 = pnand %p917_p1, %p1587_p4 }
  0x22   : > { %s1006_s15 = scalar_lea.hbm %s1602_s2, 1024  ;;  %p1008_p7 = pneg %p1313_p2 }
  0x23   : > { %p1007_p3 = scmp.ne.s32.totalorder %s1602_s2, %s1006_s15  ;;  %p1013_p10 = scmp.lt.u32.totalorder %s1006_s15, %s1602_s2 }
  0x25   : > { %p1009_p8 = pnand %p1008_p7, %p1007_p3 }
  0x27   : > { %p1010_p9 = pneg %p1009_p8 }
  0x29   : > { %p1015_p1 = pnand %p1013_p10, %p1010_p9 }
  0x2b   : > { %1018 = shalt.err (!%p1015_p1)
}
  0x2c   : > { %s1019_s26 = scalar_lea.vmem %s184_s9, 1024  ;;  %p1027_p11 = scmp.lt.s32.totalorder %s184_s9, %s184_s9 }
  0x2d   : > { %p1020_p4 = scmp.ne.s32.totalorder %s184_s9, %s1019_s26  ;;  %p1028_p6 = scmp.lt.s32.totalorder %s1019_s26, %s1019_s26 }
  0x2f   : > { %p1022_p0 = pnand %p1020_p4, %p1008_p7  ;;  %p1029_p13 = por %p1028_p6, %p1027_p11 }
  0x31   : > { %p1023_p12 = pneg %p1022_p0 }
  0x33   : > { %p1030_p5 = pnand %p1029_p13, %p1023_p12 }
  0x35   : > { %1033 = shalt.err (!%p1030_p5)
}
  0x36   : > { %s1205_s8 = smov 64   ;;  %s1206_s11 = smov 4  }
  0x37   : > { %920 = dma.hbm_to_vmem [thread:$0]  (!%p1313_p2), %s1602_s2, 1024, %s184_s9, [#allocation6], %s1205_s8, %s1205_s8, %s1206_s11  }
  0x38   : > { %p1603_p3 = scmp.ne.s32.totalorder %s1596_s28, 0  ;;  %p1604_p8 = scmp.lt.s32.totalorder %s1201_s21, 4 }
  0x39   : > { %s1606_s3 = sld [smem:[#allocation19_spill]] }
  0x3a   : > { %p1344_p4 = pnand %p1604_p8, %p1603_p3 }
  0x3c   : > { %s1605_s15 = scalar_select %p1344_p4, 1, 0 }
  0x3f   : > { %s1034_s23 = scalar_lea.hbm %s1606_s3, 1024 }
  0x40   : > { %p1035_p5 = scmp.ne.s32.totalorder %s1606_s3, %s1034_s23  ;;  %p1041_p12 = scmp.lt.u32.totalorder %s1034_s23, %s1606_s3 }
  0x42   : > { %p1037_p6 = pnand %p1035_p5, %p1008_p7 }
  0x44   : > { %p1038_p11 = pneg %p1037_p6 }
  0x46   : > { %p1043_p13 = pnand %p1041_p12, %p1038_p11 }
  0x48   : > { %1046 = shalt.err (!%p1043_p13)
}
  0x49   : > { %s1047_s13 = scalar_lea.vmem %s197_s12, 1024  ;;  %p1055_p1 = scmp.lt.s32.totalorder %s197_s12, %s197_s12 }
  0x4a   : > { %p1048_p0 = scmp.ne.s32.totalorder %s197_s12, %s1047_s13  ;;  %p1056_p3 = scmp.lt.s32.totalorder %s1047_s13, %s1047_s13 }
  0x4c   : > { %p1050_p9 = pnand %p1048_p0, %p1008_p7  ;;  %p1057_p8 = por %p1056_p3, %p1055_p1 }
  0x4e   : > { %p1051_p10 = pneg %p1050_p9 }
  0x50   : > { %p1058_p4 = pnand %p1057_p8, %p1051_p10 }
  0x52   : > { %1061 = shalt.err (!%p1058_p4)
}
  0x53   : > { %923 = dma.hbm_to_vmem [thread:$0]  (!%p1313_p2), %s1606_s3, 1024, %s197_s12, [#allocation9], %s1205_s8, %s1205_s8, %s1206_s11  }
  0x54   : > { %s213_s17 = sand.u32 1, %s1197_s20   ;;  %s836_s25 = sshll.u32 %s1201_s21, 10 }
  0x55   : > { %s1369_s23 = sshll.u32 %s213_s17, 5  ;;  %s1607_s0 = sld [smem:[#allocation17_spill]] }
  0x56   : > { %s217_s10 = scalar_lea.vmem [#allocation2], %s1369_s23  ;;  %s1382_s12 = scalar_lea.sflag [#allocation3], %s213_s17 }
  0x57   : > { %s225_s13 = sshll.u32 %s217_s10, 4  ;;  %p1608_p7 = scmp.ne.s32.totalorder %s1605_s15, 0  ;;  %s1380_s13 = int_to_ptr.vmem [resolvable:$true] %s225_s13 }
  0x59   : > { %p1064_p4 = pneg %p1608_p7 }
  0x5b   : > { %s1377_s28 = scalar_lea.hbm %s1607_s0, %s836_s25  ;;  %s1067_s16 = scalar_lea.hbm %s1607_s0, 4096 }
  0x5c   : > { %s1062_s8 = scalar_lea.hbm %s1377_s28, 512  ;;  %p1068_p11 = scmp.lt.u32.totalorder %s1377_s28, %s1607_s0 }
  0x5d   : > { %p1063_p2 = scmp.ne.s32.totalorder %s1377_s28, %s1062_s8  ;;  %p1069_p12 = scmp.lt.u32.totalorder %s1067_s16, %s1062_s8 }
  0x5e   : > { %p1071_p0 = scmp.lt.u32.totalorder %s1062_s8, %s1377_s28 }
  0x5f   : > { %p1065_p5 = pnand %p1064_p4, %p1063_p2  ;;  %p1070_p13 = por %p1069_p12, %p1068_p11 }
  0x61   : > { %p1066_p6 = pneg %p1065_p5  ;;  %p1072_p9 = por %p1071_p0, %p1070_p13 }
  0x63   : > { %p1073_p10 = pnand %p1072_p9, %p1066_p6 }
  0x65   : > { %1076 = shalt.err (!%p1073_p10)
}
  0x66   : > { %s1077_s17 = scalar_lea.vmem %s1380_s13, 512  ;;  %s1207_s10 = smov [#allocation2]  }
  0x67   : > { %p1078_p1 = scmp.ne.s32.totalorder %s1380_s13, %s1077_s17  ;;  %s1082_s11 = sshll.u32 %s1207_s10, 4  ;;  %s1083_s11 = int_to_ptr.vmem [resolvable:$false] %s1082_s11 }
  0x68   : > { %s1084_s14 = scalar_lea.vmem %s1083_s11, 1024  ;;  %p1085_p2 = scmp.lt.s32.totalorder %s1380_s13, %s1083_s11 }
  0x69   : > { %p1080_p3 = pnand %p1078_p1, %p1064_p4  ;;  %p1086_p5 = scmp.lt.s32.totalorder %s1084_s14, %s1077_s17 }
  0x6b   : > { %p1081_p8 = pneg %p1080_p3  ;;  %p1087_p11 = por %p1086_p5, %p1085_p2 }
  0x6d   : > { %p1088_p12 = pnand %p1087_p11, %p1081_p8 }
  0x6f   : > { %1091 = shalt.err (!%p1088_p12)
}
  0x70   : > { %s1208_s8 = smov 256   ;;  %s1209_s16 = smov 128  }
  0x71   : > { %s1210_s26 = smov 8   ;;  %s719_s10 = scalar_lea.hbm %s1582_s1, %s836_s25 }
  0x72   : > { %927 = dma.hbm_to_vmem [thread:$0]  (!%p1608_p7), %s1377_s28, 512, %s1380_s13, %s1382_s12, %s1208_s8, %s1209_s16, %s1210_s26  }
  0x73   : > { %s1418_s11 = scalar_lea.hbm %s719_s10, 128  ;;  %s239_s14 = scalar_lea.vmem [#allocation5], %s1369_s23 }
  0x74   : > { %s248_s0 = sshll.u32 %s239_s14, 4  ;;  %s235_s2 = sand.u32 1, %s1201_s21   ;;  %s1421_s0 = int_to_ptr.vmem [resolvable:$true] %s248_s0 }
  0x75   : > { %s1424_s3 = scalar_lea.sflag [#allocation6], %s235_s2  ;;  %s1122_s27 = scalar_lea.hbm %s719_s10, 640 }
  0x76   : > { %p1093_p6 = scmp.ne.s32.totalorder %s1418_s11, %s1122_s27  ;;  %s1097_s13 = scalar_lea.hbm %s1582_s1, 4096 }
  0x77   : > { %p1098_p9 = scmp.lt.u32.totalorder %s1418_s11, %s1582_s1  ;;  %p1099_p10 = scmp.lt.u32.totalorder %s1097_s13, %s1122_s27 }
  0x78   : > { %p1095_p13 = pnand %p1093_p6, %p1064_p4  ;;  %p1101_p3 = scmp.lt.u32.totalorder %s1122_s27, %s1418_s11 }
  0x79   : > { %p1100_p1 = por %p1099_p10, %p1098_p9 }
  0x7a   : > { %p1096_p0 = pneg %p1095_p13 }
  0x7b   : > { %p1102_p8 = por %p1101_p3, %p1100_p1 }
  0x7d   : > { %p1103_p2 = pnand %p1102_p8, %p1096_p0 }
  0x7f   : > { %1106 = shalt.err (!%p1103_p2)
}
  0x80   : > { %s1107_s2 = scalar_lea.vmem %s1421_s0, 512  ;;  %s1211_s23 = smov [#allocation5]  }
  0x81   : > { %p1108_p5 = scmp.ne.s32.totalorder %s1421_s0, %s1107_s2  ;;  %s1112_s17 = sshll.u32 %s1211_s23, 4  ;;  %s1113_s17 = int_to_ptr.vmem [resolvable:$false] %s1112_s17 }
  0x82   : > { %s1114_s10 = scalar_lea.vmem %s1113_s17, 1024  ;;  %p1115_p6 = scmp.lt.s32.totalorder %s1421_s0, %s1113_s17 }
  0x83   : > { %p1110_p11 = pnand %p1108_p5, %p1064_p4  ;;  %p1116_p13 = scmp.lt.s32.totalorder %s1114_s10, %s1107_s2 }
  0x85   : > { %p1111_p12 = pneg %p1110_p11  ;;  %p1117_p9 = por %p1116_p13, %p1115_p6 }
  0x87   : > { %p1118_p10 = pnand %p1117_p9, %p1111_p12 }
  0x89   : > { %1121 = shalt.err (!%p1118_p10)
}
  0x8a   : > { %930 = dma.hbm_to_vmem [thread:$0]  (!%p1608_p7), %s1418_s11, 512, %s1421_s0, %s1424_s3, %s1208_s8, %s1209_s16, %s1210_s26  }
  0x8b   : > { %p1609_p4 = scmp.ne.s32.totalorder %s1600_s7, 0 }
  0x8c   : > { %s1455_s27 = sand.u32 (!%p1609_p4), 1, %s1193_s19   ;;  %p1610_p0 = scmp.ne.s32.totalorder (!%p1609_p4), %s1597_s29, 0 }
  0x8d   : > { %260 = sbr.rel (%p1609_p4) target bundleno = 590 (0x24e), region = 40  ;;  %s1458_s14 = sshll.u32 (!%p1609_p4), %s1455_s27, 5 }
  0x8e   : > { %s263_s15 = scalar_lea.sflag (!%p1609_p4), [#allocation3], %s1455_s27  ;;  %s266_s28 = scalar_lea.vmem (!%p1609_p4), [#allocation2], %s1458_s14 }
  0x94   : > { %1168 = dma.done.wait (%p1610_p0), %s263_s15, 512  }
  0x95   : > { %1170 = vsyncadd (%p1610_p0), %s263_s15, 4294966784  ;;  %s271_s0 = sand.u32 1, %s1266_s22   ;;  %s275_s7 = scalar_lea.vmem [#allocation5], %s1458_s14 }
  0x96   : > { %s272_s3 = scalar_lea.sflag [#allocation6], %s271_s0 }
  0x97   : > { %1172 = dma.done.wait (%p1610_p0), %s272_s3, 512  }
  0x98   : > { %1174 = vsyncadd (%p1610_p0), %s272_s3, 4294966784  ;;  %p1611_p7 = scmp.eq.s32.totalorder %s1266_s22, 0 }
  0x9a   : > { %1176 = dma.done.wait (%p1611_p7), [#allocation6], 1024   ;;  %p1612_p1 = pmov %p1611_p7 }
  0x9c   : > { %1178 = vsyncadd (%p1612_p1), [#allocation6], 4294966272  ;;  %p1613_p3 = pmov %p1612_p1 }
  0x9d   : > { %p1614_p8 = pmov %p1612_p1 }
  0x9e   : > { %1180 = dma.done.wait (%p1613_p3), [#allocation9], 1024  }
  0x9f   : > { %1182 = vsyncadd (%p1614_p8), [#allocation9], 4294966272  ;;  %v1480_v0 = vld [vmem:[%s275_s7] sm:$0xff]  ;;  %v1486_v2 = vld [vmem:[%s275_s7 + $0x8] sm:$0xff]  ;;  %s314_s16 = scalar_lea.vmem [#allocation10], %s1458_s14  ;;  %s838_s11 = sshll.u32 %s1266_s22, 9 }
  0xa0   : > { %v1482_v1 = vld [vmem:[%s266_s28] sm:$0xff]  ;;  %335 = vadd.xlane.f32.xlu1 %v1480_v0  ;;  %v1488_v3 = vld [vmem:[%s266_s28 + $0x8] sm:$0xff]  ;;  %v1490_v4 = vld [vmem:[%s266_s28 + $0x18] sm:$0xff]  ;;  %v360_v10 = vmul.f32 %v1486_v2, %v1486_v2  ;;  %v359_v11 = vmul.f32 %v1480_v0, %v1480_v0  ;;  %s678_s26 = sshll.u32 %s314_s16, 4  ;;  %s1538_s12 = scalar_lea.hbm %s1586_s5, %s838_s11  ;;  %s1533_s26 = int_to_ptr.vmem [resolvable:$true] %s678_s26 }
  0xa1   : > { %327 = vadd.xlane.f32.xlu0 %v1482_v1  ;;  %v1492_v5 = vld [vmem:[%s266_s28 + $0x10] sm:$0xff]  ;;  %v1496_v6 = vld [vmem:[%s275_s7 + $0x18] sm:$0xff]  ;;  %v348_v8 = vmul.f32 %v1488_v3, %v1488_v3  ;;  %v347_v9 = vmul.f32 %v1482_v1, %v1482_v1  ;;  %v350_v12 = vmul.f32 %v1490_v4, %v1490_v4  ;;  %v982_v16 = vld [vmem:[#allocation8] sm:$0xff]   ;;  %s665_s22 = scalar_lea.sflag [#allocation4], %s1455_s27  ;;  %s1123_s9 = scalar_lea.vmem %s1533_s26, 512 }
  0xa2   : > { %v1498_v7 = vld [vmem:[%s275_s7 + $0x10] sm:$0xff]  ;;  %v349_v13 = vmul.f32 %v1492_v5, %v1492_v5  ;;  %v362_v14 = vmul.f32 %v1496_v6, %v1496_v6  ;;  %v983_v17 = vld [vmem:[#allocation7] sm:$0xff]   ;;  %859 = vmatprep.subr.bf16.mxu1 %v982_v16  ;;  %v984_v18 = vld [vmem:[#allocation8 + $0x8] sm:$0xff]   ;;  %p1124_p2 = scmp.ne.s32.totalorder %s1533_s26, %s1123_s9  ;;  %p1615_p5 = scmp.ne.s32.totalorder %s1598_s30, 0 }
  0xa3   : > { %v361_v15 = vmul.f32 %v1498_v7, %v1498_v7  ;;  %879 = vmatprep.subr.bf16.mxu0 %v983_v17  ;;  %860 = vmatpush3.bf16.msra.mxu1 %v982_v16  ;;  %v985_v19 = vld [vmem:[#allocation7 + $0x8] sm:$0xff]   ;;  %v986_v20 = vld [vmem:[#allocation8 + $0x10] sm:$0xff]   ;;  %v988_v22 = vld [vmem:[#allocation8 + $0x18] sm:$0xff]   ;;  %s1212_s2 = smov [#allocation10]  }
  0xa4   : > { %337 = vadd.xlane.f32.xlu1 %v1486_v2  ;;  %880 = vmatpush3.bf16.msra.mxu0 %v983_v17  ;;  %v987_v21 = vld [vmem:[#allocation7 + $0x10] sm:$0xff]   ;;  %v989_v23 = vld [vmem:[#allocation7 + $0x18] sm:$0xff]   ;;  %v990_v24 = vld [vmem:[#allocation8 + $0x20] sm:$0xff]   ;;  %p1125_p11 = pnand %p1124_p2, %p1615_p5  ;;  %s1127_s23 = sshll.u32 %s1212_s2, 4  ;;  %s1128_s23 = int_to_ptr.vmem [resolvable:$false] %s1127_s23 }
  0xa5   : > { %329 = vadd.xlane.f32.xlu0 %v1488_v3  ;;  %861 = vmatprep.subr.bf16.mxu1 %v984_v18  ;;  %v991_v25 = vld [vmem:[#allocation7 + $0x20] sm:$0xff]   ;;  %v992_v26 = vld [vmem:[#allocation8 + $0x28] sm:$0xff]   ;;  %v994_v28 = vld [vmem:[#allocation8 + $0x30] sm:$0xff]   ;;  %s1129_s17 = scalar_lea.vmem %s1128_s23, 1024  ;;  %p1130_p6 = scmp.lt.s32.totalorder %s1533_s26, %s1128_s23 }
  0xa6   : > { %881 = vmatprep.subr.bf16.mxu0 %v985_v19  ;;  %v993_v27 = vld [vmem:[#allocation7 + $0x28] sm:$0xff]   ;;  %v995_v29 = vld [vmem:[#allocation7 + $0x30] sm:$0xff]   ;;  %v996_v30 = vld [vmem:[#allocation8 + $0x38] sm:$0xff]   ;;  %p1126_p12 = pneg %p1125_p11  ;;  %p1131_p13 = scmp.lt.s32.totalorder %s1129_s17, %s1123_s9 }
  0xa7   : > { %862 = vmatpush3.bf16.msra.mxu1 %v984_v18  ;;  %v997_v31 = vld [vmem:[#allocation7 + $0x38] sm:$0xff]  }
  0xa8   : > { %333 = vadd.xlane.f32.xlu1 %v1490_v4  ;;  %882 = vmatpush3.bf16.msra.mxu0 %v985_v19  ;;  %p1132_p9 = por %p1131_p13, %p1130_p6 }
  0xa9   : > { %331 = vadd.xlane.f32.xlu0 %v1492_v5  ;;  %863 = vmatprep.subr.bf16.mxu1 %v986_v20 }
  0xaa   : > { %883 = vmatprep.subr.bf16.mxu0 %v987_v21  ;;  %p1133_p10 = pnand %p1132_p9, %p1126_p12 }
  0xab   : > { %864 = vmatpush3.bf16.msra.mxu1 %v986_v20 }
  0xac   : > { %341 = vadd.xlane.f32.xlu1 %v1496_v6  ;;  %884 = vmatpush3.bf16.msra.mxu0 %v987_v21 }
  0xad   : > { %339 = vadd.xlane.f32.xlu0 %v1498_v7  ;;  %865 = vmatprep.subr.bf16.mxu1 %v988_v22 }
  0xae   : > { %885 = vmatprep.subr.bf16.mxu0 %v989_v23 }
  0xaf   : > { %866 = vmatpush3.bf16.msra.mxu1 %v988_v22 }
  0xb0   : > { %353 = vadd.xlane.f32.xlu1 %v348_v8  ;;  %886 = vmatpush3.bf16.msra.mxu0 %v989_v23 }
  0xb1   : > { %351 = vadd.xlane.f32.xlu0 %v347_v9  ;;  %867 = vmatprep.subr.bf16.mxu1 %v990_v24 }
  0xb2   : > { %887 = vmatprep.subr.bf16.mxu0 %v991_v25 }
  0xb3   : > { %868 = vmatpush3.bf16.msra.mxu1 %v990_v24 }
  0xb4   : > { %365 = vadd.xlane.f32.xlu1 %v360_v10  ;;  %888 = vmatpush3.bf16.msra.mxu0 %v991_v25 }
  0xb5   : > { %363 = vadd.xlane.f32.xlu0 %v359_v11  ;;  %869 = vmatprep.subr.bf16.mxu1 %v992_v26 }
  0xb6   : > { %889 = vmatprep.subr.bf16.mxu0 %v993_v27 }
  0xb7   : > { %870 = vmatpush3.bf16.msra.mxu1 %v992_v26 }
  0xb8   : > { %357 = vadd.xlane.f32.xlu1 %v350_v12  ;;  %890 = vmatpush3.bf16.msra.mxu0 %v993_v27 }
  0xb9   : > { %355 = vadd.xlane.f32.xlu0 %v349_v13  ;;  %871 = vmatprep.subr.bf16.mxu1 %v994_v28 }
  0xba   : > { %891 = vmatprep.subr.bf16.mxu0 %v995_v29 }
  0xbb   : > { %872 = vmatpush3.bf16.msra.mxu1 %v994_v28 }
  0xbc   : > { %369 = vadd.xlane.f32.xlu1 %v362_v14  ;;  %892 = vmatpush3.bf16.msra.mxu0 %v995_v29 }
  0xbd   : > { %367 = vadd.xlane.f32.xlu0 %v361_v15  ;;  %873 = vmatprep.subr.bf16.mxu1 %v996_v30 }
  0xbe   : > { %893 = vmatprep.subr.bf16.mxu0 %v997_v31 }
  0xbf   : > { %874 = vmatpush3.bf16.msra.mxu1 %v996_v30 }
  0xc0   : > { %894 = vmatpush3.bf16.msra.mxu0 %v997_v31 }
 0x12d   : > { %v336_v32 = vpop.xlane.xlu1 %335 }
 0x12e   : > { %v328_v33 = vpop.xlane.xlu0 %327 }
 0x12f   : > { %v343_v40 = vadd.f32 %v336_v32, %v328_v33 }
 0x131   : > { %v338_v34 = vpop.xlane.xlu1 %337  ;;  %v375_v44 = vmul.f32 0.00390625, %v343_v40 }
 0x132   : > { %v330_v35 = vpop.xlane.xlu0 %329 }
 0x133   : > { %v344_v41 = vadd.f32 %v338_v34, %v330_v35  ;;  %v383_v51 = vmul.f32 %v375_v44, %v375_v44  ;;  %v413_v27 = vsub.f32 %v1480_v0, %v375_v44  ;;  %v403_v28 = vsub.f32 %v1482_v1, %v375_v44 }
 0x135   : > { %v334_v36 = vpop.xlane.xlu1 %333  ;;  %v376_v45 = vmul.f32 0.00390625, %v344_v41 }
 0x136   : > { %v332_v37 = vpop.xlane.xlu0 %331 }
 0x137   : > { %v384_v54 = vmul.f32 %v376_v45, %v376_v45  ;;  %v414_v24 = vsub.f32 %v1486_v2, %v376_v45  ;;  %v404_v25 = vsub.f32 %v1488_v3, %v376_v45 }
 0x139   : > { %v342_v38 = vpop.xlane.xlu1 %341 }
 0x13a   : > { %v340_v39 = vpop.xlane.xlu0 %339  ;;  %v346_v50 = vadd.f32 %v342_v38, %v334_v36 }
 0x13b   : > { %v345_v52 = vadd.f32 %v340_v39, %v332_v37 }
 0x13c   : > { %v378_v60 = vmul.f32 0.00390625, %v346_v50 }
 0x13d   : > { %v354_v42 = vpop.xlane.xlu1 %353  ;;  %v377_v61 = vmul.f32 0.00390625, %v345_v52 }
 0x13e   : > { %v352_v43 = vpop.xlane.xlu0 %351  ;;  %v386_v14 = vmul.f32 %v378_v60, %v378_v60  ;;  %v406_v36 = vsub.f32 %v1490_v4, %v378_v60  ;;  %v416_v2 = vsub.f32 %v1496_v6, %v378_v60  ;;  %v829_v6 = vld [vmem:[%s1585_s4] ss:$0 sm:$0xff] }
 0x13f   : > { %v385_v16 = vmul.f32 %v377_v61, %v377_v61  ;;  %v405_v3 = vsub.f32 %v1492_v5, %v377_v61  ;;  %v415_v0 = vsub.f32 %v1498_v7, %v377_v61 }
 0x141   : > { %v366_v46 = vpop.xlane.xlu1 %365 }
 0x142   : > { %v364_v47 = vpop.xlane.xlu0 %363  ;;  %v372_v48 = vadd.f32 %v366_v46, %v354_v42 }
 0x143   : > { %v371_v49 = vadd.f32 %v364_v47, %v352_v43 }
 0x144   : > { %v380_v53 = vmul.f32 0.00390625, %v372_v48 }
 0x145   : > { %v379_v55 = vmul.f32 0.00390625, %v371_v49  ;;  %v358_v56 = vpop.xlane.xlu1 %357 }
 0x146   : > { %v356_v57 = vpop.xlane.xlu0 %355  ;;  %v388_v58 = vsub.f32 %v380_v53, %v384_v54 }
 0x147   : > { %v387_v59 = vsub.f32 %v379_v55, %v383_v51 }
 0x148   : > { %v392_v62 = vmax.f32 %v388_v58, 0.0 }
 0x149   : > { %v391_v63 = vmax.f32 %v387_v59, 0.0  ;;  %v370_v8 = vpop.xlane.xlu1 %369 }
 0x14a   : > { %v368_v9 = vpop.xlane.xlu0 %367  ;;  %v396_v10 = vadd.f32 1e-05, %v392_v62  ;;  %v374_v12 = vadd.f32 %v370_v8, %v358_v56 }
 0x14b   : > { %v395_v11 = vadd.f32 1e-05, %v391_v63  ;;  %v373_v13 = vadd.f32 %v368_v9, %v356_v57 }
 0x14c   : > { %998 = vrsqrt.f32 %v396_v10  ;;  %v382_v15 = vmul.f32 0.00390625, %v374_v12 }
 0x14d   : > { %v381_v17 = vmul.f32 0.00390625, %v373_v13  ;;  %1000 = vrsqrt.f32 %v395_v11 }
 0x14e   : > { %v390_v18 = vsub.f32 %v382_v15, %v386_v14 }
 0x14f   : > { %v389_v19 = vsub.f32 %v381_v17, %v385_v16 }
 0x150   : > { %v394_v20 = vmax.f32 %v390_v18, 0.0 }
 0x151   : > { %v393_v21 = vmax.f32 %v389_v19, 0.0 }
 0x152   : > { %v398_v22 = vadd.f32 1e-05, %v394_v20 }
 0x153   : > { %v397_v23 = vadd.f32 1e-05, %v393_v21 }
 0x154   : > { %1002 = vrsqrt.f32 %v398_v22 }
 0x155   : > { %1004 = vrsqrt.f32 %v397_v23 }
 0x156   : > { %v999_v26 = vpop.eup %998 }
 0x157   : > { %v1001_v29 = vpop.eup %1000  ;;  %v418_v30 = vmul.f32 %v999_v26, %v414_v24  ;;  %v408_v31 = vmul.f32 %v999_v26, %v404_v25 }
 0x158   : > { %v417_v32 = vmul.f32 %v1001_v29, %v413_v27  ;;  %v407_v33 = vmul.f32 %v1001_v29, %v403_v28 }
 0x15a   : > { %v421_v34 = vpack.c.bf16 %v418_v30, %v417_v32  ;;  %v411_v35 = vpack.c.bf16 %v408_v31, %v407_v33 }
 0x15c   : > { %875 = vmatprep.mubr.bf16.mxu1 %v421_v34  ;;  %895 = vmatprep.mubr.bf16.mxu0 %v411_v35 }
 0x15e   : > { %v1003_v37 = vpop.eup %1002 }
 0x15f   : > { %v1005_v1 = vpop.eup %1004  ;;  %v420_v38 = vmul.f32 %v1003_v37, %v416_v2  ;;  %v410_v39 = vmul.f32 %v1003_v37, %v406_v36 }
 0x160   : > { %v419_v40 = vmul.f32 %v1005_v1, %v415_v0  ;;  %v409_v41 = vmul.f32 %v1005_v1, %v405_v3 }
 0x162   : > { %v422_v42 = vpack.c.bf16 %v420_v38, %v419_v40  ;;  %v412_v43 = vpack.c.bf16 %v410_v39, %v409_v41 }
 0x164   : > { %876 = vmatmul.mubr.bf16.vlgmr.msra.gmra.mrb[0].mxu1 %v422_v42  ;;  %896 = vmatmul.mubr.bf16.vlgmr.msra.gmra.mrb[0].mxu0 %v412_v43 }
 0x237   : > { %v877_v44 = vpop.f32.mrb[0].mxu1  ;;  %v897_v4 = vpop.f32.mrb[0].mxu0 }
 0x238   : > { %v643_v45 = vadd.f32 %v897_v4, %v877_v44  ;;  %v537_v5 = vpop.f32.mrb[1].mxu1  ;;  %v634_v7 = vpop.f32.mrb[1].mxu0 }
 0x239   : > { %v635_v46 = vadd.f32 %v634_v7, %v537_v5  ;;  %v878_v47 = vpop.f32.mrb[2].mxu1  ;;  %v898_v48 = vpop.f32.mrb[2].mxu0 }
 0x23a   : > { %v658_v49 = vadd.f32 %v829_v6, %v643_v45  ;;  %v646_v50 = vadd.f32 %v898_v48, %v878_v47  ;;  %v540_v51 = vpop.f32.mrb[3].mxu1  ;;  %v637_v52 = vpop.f32.mrb[3].mxu0 }
 0x23b   : > { %v656_v53 = vadd.f32 %v829_v6, %v635_v46  ;;  %v638_v54 = vadd.f32 %v637_v52, %v540_v51 }
 0x23c   : > { %662 = vst [vmem:[%s314_s16 + $0x10] sm:$0xff] %v658_v49  ;;  %v659_v55 = vadd.f32 %v829_v6, %v646_v50 }
 0x23d   : > { %660 = vst [vmem:[%s314_s16] sm:$0xff] %v656_v53  ;;  %v657_v56 = vadd.f32 %v829_v6, %v638_v54 }
 0x23e   : > { %663 = vst [vmem:[%s314_s16 + $0x18] sm:$0xff] %v659_v55 }
 0x23f   : > { %661 = vst [vmem:[%s314_s16 + $0x8] sm:$0xff] %v657_v56 }
 0x240   : > { %1136 = shalt.err (!%p1133_p10)
}
 0x241   : > { %s1137_s10 = scalar_lea.hbm %s1538_s12, 512  ;;  %s1141_s28 = scalar_lea.hbm %s1586_s5, 2048 }
 0x242   : > { %p1138_p4 = scmp.ne.s32.totalorder %s1538_s12, %s1137_s10  ;;  %p1142_p1 = scmp.lt.u32.totalorder %s1538_s12, %s1586_s5 }
 0x243   : > { %p1143_p3 = scmp.lt.u32.totalorder %s1141_s28, %s1137_s10  ;;  %p1145_p2 = scmp.lt.u32.totalorder %s1137_s10, %s1538_s12 }
 0x244   : > { %p1139_p0 = pnand %p1138_p4, %p1615_p5 }
 0x245   : > { %p1144_p8 = por %p1143_p3, %p1142_p1 }
 0x246   : > { %p1140_p7 = pneg %p1139_p0 }
 0x247   : > { %p1146_p11 = por %p1145_p2, %p1144_p8 }
 0x249   : > { %p1147_p12 = pnand %p1146_p11, %p1140_p7 }
 0x24b   : > { %1150 = shalt.err (!%p1147_p12)
}
 0x24c   : > { %s1213_s7 = smov 128   ;;  %s1214_s29 = smov 8  }
 0x24d   : > { %915 = dma.vmem_to_hbm [thread:$0]  (%p1615_p5), %s1533_s26, 512, %s1538_s12, %s665_s22, %s1213_s7, %s1213_s7, %s1214_s29  }
 0x24e PF: > { %p940_p6 = scmp.ge.s32.totalorder %s1201_s21, 2  ;;  %s693_s8 = sand.u32 1, %s1189_s18  }
 0x24f   : > { %p1616_p13 = scmp.ne.s32.totalorder %s1599_s6, 0  ;;  %s694_s16 = scalar_lea.sflag [#allocation4], %s693_s8 }
 0x251   : > { %p932_p9 = pnand %p940_p6, %p1616_p13 }
 0x253   : > { %1184 = dma.done.wait (!%p932_p9), %s694_s16, 512  }
 0x254   : > { %1186 = vsyncadd (!%p932_p9), %s694_s16, 4294966784  ;;  %s1617_s11 = sld [smem:[#allocation16_spill]]  ;;  %p22_p10 = scmp.ge.s32.totalorder %s1270_s24, 6  }
 0x255   : > { %s1618_s18 = smov %s1193_s19  ;;  %s1619_s19 = smov %s1197_s20 }
 0x256   : > { %s1621_s21 = smov %s1270_s24  ;;  %24 = sbr.rel (!%p22_p10) target bundleno = 12 (0xc), region = 106 }
 0x25a   : > { %s1620_s20 = smov %s1617_s11 }
 0x25d   :  { %699 = vsyncpa [#allocation3], 1 }
 0x25e   :  { %701 = vsyncpa [#allocation3 + $0x1], 1 }
 0x25f   :  { %702 = vsyncpa [#allocation6], 1 }
 0x260   :  { %704 = vsyncpa [#allocation6 + $0x1], 1 }
 0x261   :  { %705 = vsyncpa [#allocation9], 1 }
 0x262   :  { %706 = vsyncpa [#allocation4], 1 }
 0x263   :  { %708 = vsyncpa [#allocation4 + $0x1], 1 }

</bundles_post_ra>
